<compile_context>
chip_gen: v7x
topology: tpu7x:2x2x1
jax: 0.10.0
libtpu: 0.0.40
codegen_flags: <defaults>
</compile_context>

<pallas_src>
import functools
import math

import jax
import jax.numpy as jnp
from jax.experimental import pallas as pl
from jax.experimental.pallas import tpu as pltpu

# Scoped-VMEM request.  Working set at 256-tiles plus a <=8 MiB resident h
# (x2 buffering) stays well below this, and 32 MiB leaves headroom even on
# v7x's 64 MiB physical VMEM (v5e/v6e have 128 MiB).
_VMEM_LIMIT_BYTES = 32 * 1024 * 1024

# h is kept fully VMEM-resident across the adjacency column sweep when the
# padded (Np, Dp) buffer is at most this big; above it, h streams one
# (tile_n, Dp) block per j step.
_RESIDENT_H_BYTES = 8 * 1024 * 1024


def _round_up(x, m):
    return (x + m - 1) // m * m


def _project_kernel(x_ref, w_ref, a1_ref, a2_ref, h_ref, f1_ref, f2_ref):
    """h = x @ W on the MXU (bf16 operands, f32 accumulation); f1/f2 attention
    terms via VPU mul + lane reduce (a (Tm,Dp)@(Dp,1) matvec would waste the MXU)."""
    h = jnp.dot(x_ref[...], w_ref[...], preferred_element_type=jnp.float32)  # (Tm, Dp) f32
    h_ref[...] = h.astype(h_ref.dtype)
    # Attention projections from the f32 accumulator: keeps the logits that feed
    # exp() in kernel 2 as accurate as possible.
    f1_ref[...] = jnp.sum(h * a1_ref[...], axis=-1, keepdims=True)  # (Tm, 1) source term
    f2_ref[...] = jnp.sum(h * a2_ref[...], axis=-1, keepdims=True)  # (Tm, 1) dest term


def _aggregate_kernel(occ_ref, f1_ref, f2t_ref, adj_ref, h_ref, out_ref,
                      acc_ref, rowsum_ref, *, alpha, tile_n, h_resident, concat):
    """One (row-tile i, col-tile j) step of the masked exp-softmax aggregation."""
    i = pl.program_id(0)
    j = pl.program_id(1)

    @pl.when(j == 0)
    def _():
        acc_ref[...] = jnp.zeros_like(acc_ref)
        rowsum_ref[...] = jnp.zeros_like(rowsum_ref)

    # Skip all compute on tiles with no edges (occupancy table lives in SMEM via
    # scalar prefetch).  An empty tile contributes exactly zero, so the skip is
    # bit-exact and lets the kernel scale with the number of occupied tiles.
    @pl.when(occ_ref[i, j] > 0)
    def _():
        logits = f1_ref[...] + f2t_ref[...]                     # (Tm,1)+(1,Tn) -> (Tm,Tn)
        lrelu = jnp.where(logits > 0, logits, alpha * logits)   # LeakyReLU
        # Compare the int8 adjacency directly (no int8->f32 unpack); keep the
        # where-select (not a multiply) so a masked overflow can never become NaN.
        e = jnp.where(adj_ref[...] != 0, jnp.exp(lrelu), 0.0)   # (Tm, Tn) f32

        rowsum_ref[...] += jnp.sum(e, axis=-1, keepdims=True)   # running rowsum

        if h_resident:
            # h is fully VMEM-resident; slice this column tile in-kernel.
            start = pl.multiple_of(j * tile_n, tile_n)
            h_blk = h_ref[pl.ds(start, tile_n), :]              # (Tn, Dp)
        else:
            h_blk = h_ref[...]                                  # (Tn, Dp) streamed per j
        # bf16 (or f32) operands, f32 accumulation on the MXU.
        acc_ref[...] += jnp.dot(e.astype(h_blk.dtype), h_blk,
                                preferred_element_type=jnp.float32)

    @pl.when(j == pl.num_programs(1) - 1)
    def _():
        # EUP approximate reciprocal instead of a VALU divide (finalize only).
        inv = pl.reciprocal(rowsum_ref[...] + 9e-15, approx=True)
        h_prime = acc_ref[...] * inv
        if concat:
            out_ref[...] = jnp.where(h_prime > 0, h_prime, jnp.exp(h_prime) - 1.0)  # ELU
        else:
            out_ref[...] = h_prime


def sparse_gat_layer(x, adj_mask, W, attn, alpha=0.2, *, concat=True,
                     matmul_dtype=jnp.bfloat16, tile_m=256, tile_n=256):
    """Pallas implementation of SparseGATLayer.forward.

    x:        (N, F_in)   dense node features
    adj_mask: (N, N)      adjacency pattern; nonzero == edge.  Pass bool/int8 so
                          the wrapper never reads an O(N^2) f32 array.
    W:        (F_in, F_out)
    attn:     (1, 2*F_out)
    matmul_dtype: operand dtype for the two MXU matmuls (accumulation is always
                  f32).  bf16 is the fast path on v5e/v6e/v7x; f32 reproduces
                  the reference numerics almost exactly.
    """
    N, F_in = x.shape
    D = W.shape[1]

    # Lane-dense feature dims: pad F_out and F_in up to multiples of 128.  Zero
    # rows/cols are inert through every op and are sliced off at the end.
    Dp = _round_up(D, 128)
    Fp = _round_up(F_in, 128)

    # Keep tiles no larger than the (padded) node count; pad N to a tile multiple.
    tile_m = min(tile_m, _round_up(N, 128))
    tile_n = min(tile_n, _round_up(N, 128))
    Np = _round_up(N, math.lcm(tile_m, tile_n))
    gm, gn = Np // tile_m, Np // tile_n

    x_p = jnp.pad(x.astype(matmul_dtype), ((0, Np - N), (0, Fp - F_in)))
    W_p = jnp.pad(W.astype(matmul_dtype), ((0, Fp - F_in), (0, Dp - D)))
    a1_p = jnp.pad(attn[:, :D].astype(jnp.float32), ((0, 0), (0, Dp - D)))   # source term
    a2_p = jnp.pad(attn[:, D:].astype(jnp.float32), ((0, 0), (0, Dp - D)))   # dest term

    # Stream the O(N^2) adjacency as int8 (near-free cast when the caller already
    # provides bool/int8).  Padded rows/cols carry no edges.
    adj_p = jnp.pad((adj_mask != 0).astype(jnp.int8), ((0, Np - N), (0, Np - N)))

    # Per-tile occupancy (0/1), scalar-prefetched into SMEM for the compute skip.
    blk_occ = jnp.any(
        (adj_p != 0).reshape(gm, tile_m, gn, tile_n), axis=(1, 3)).astype(jnp.int32)

    # ---- kernel 1: feature transform + per-node attention terms ------------
    h, f1, f2 = pl.pallas_call(
        _project_kernel,
        out_shape=(
            jax.ShapeDtypeStruct((Np, Dp), matmul_dtype),   # h (streamed to kernel 2)
            jax.ShapeDtypeStruct((Np, 1), jnp.float32),     # f1 (source logit term)
            jax.ShapeDtypeStruct((Np, 1), jnp.float32),     # f2 (dest logit term)
        ),
        grid_spec=pltpu.PrefetchScalarGridSpec(
            num_scalar_prefetch=0,
            grid=(Np // tile_m,),
            in_specs=[
                pl.BlockSpec((tile_m, Fp), lambda i: (i, 0)),
                pl.BlockSpec((Fp, Dp), lambda i: (0, 0)),
                pl.BlockSpec((1, Dp), lambda i: (0, 0)),
                pl.BlockSpec((1, Dp), lambda i: (0, 0)),
            ],
            out_specs=(
                pl.BlockSpec((tile_m, Dp), lambda i: (i, 0)),
                pl.BlockSpec((tile_m, 1), lambda i: (i, 0)),
                pl.BlockSpec((tile_m, 1), lambda i: (i, 0)),
            ),
        ),
        compiler_params=pltpu.CompilerParams(
            dimension_semantics=("parallel",),
            vmem_limit_bytes=_VMEM_LIMIT_BYTES,
        ),
    )(x_p, W_p, a1_p, a2_p)

    # (Np, 1) -> (1, Np): contiguous reshape, no data movement (replaces the
    # previous explicit transpose).
    f2t = f2.reshape(1, Np)

    # Keep h fully VMEM-resident across the j sweep when it fits the budget;
    # otherwise stream one (tile_n, Dp) block per j step.
    h_resident = Np * Dp * jnp.dtype(matmul_dtype).itemsize <= _RESIDENT_H_BYTES
    if h_resident:
        h_spec = pl.BlockSpec((Np, Dp), lambda i, j, occ: (0, 0))
    else:
        h_spec = pl.BlockSpec((tile_n, Dp), lambda i, j, occ: (j, 0))

    # ---- kernel 2: tiled masked-softmax aggregation over the adjacency -----
    out_p = pl.pallas_call(
        functools.partial(_aggregate_kernel, alpha=alpha, tile_n=tile_n,
                          h_resident=h_resident, concat=concat),
        out_shape=jax.ShapeDtypeStruct((Np, Dp), jnp.float32),
        grid_spec=pltpu.PrefetchScalarGridSpec(
            num_scalar_prefetch=1,                     # blk_occ -> SMEM
            grid=(gm, gn),
            in_specs=[
                pl.BlockSpec((tile_m, 1), lambda i, j, occ: (i, 0)),       # f1[i]
                pl.BlockSpec((1, tile_n), lambda i, j, occ: (0, j)),       # f2[j] row
                pl.BlockSpec((tile_m, tile_n), lambda i, j, occ: (i, j)),  # adj tile (int8)
                h_spec,                                                    # h (resident or streamed)
            ],
            out_specs=pl.BlockSpec((tile_m, Dp), lambda i, j, occ: (i, 0)),
            scratch_shapes=[
                pltpu.VMEM((tile_m, Dp), jnp.float32),   # sum_j e * h[j]
                pltpu.VMEM((tile_m, 1), jnp.float32),    # rowsum
            ],
        ),
        compiler_params=pltpu.CompilerParams(
            dimension_semantics=("parallel", "arbitrary"),
            vmem_limit_bytes=_VMEM_LIMIT_BYTES,
        ),
    )(blk_occ, f1, f2t, adj_p, h)

    return out_p[:N, :D]


def _reference(x, adj_mask, W, attn, alpha=0.2):
    """Pure-JAX f32 reference of the same math (for verification)."""
    D = W.shape[1]
    h = x @ W
    f1 = h @ attn[:, :D].T            # (N, 1)
    f2 = h @ attn[:, D:].T            # (N, 1)
    logits = f1 + f2.T
    lrelu = jnp.where(logits > 0, logits, alpha * logits)
    e = jnp.where(adj_mask != 0, jnp.exp(lrelu), 0.0)
    rowsum = e.sum(-1, keepdims=True)
    hp = (e @ h) / (rowsum + 9e-15)
    return jnp.where(hp > 0, hp, jnp.exp(hp) - 1.0)


if __name__ == "__main__":
    key = jax.random.PRNGKey(0)
    N, F_IN, F_OUT = 512, 64, 32
    ALPHA = 0.2   # LeakyReLU negative slope

    k_x, k_w, k_a, k_adj = jax.random.split(key, 4)

    # Node features.
    x = jax.random.normal(k_x, (N, F_IN), dtype=jnp.float32)

    # Deterministic Xavier-normal init (gain = 1.414), matching nn.init.xavier_normal_.
    std_w = 1.414 * (2.0 / (F_IN + F_OUT)) ** 0.5
    W = std_w * jax.random.normal(k_w, (F_IN, F_OUT), dtype=jnp.float32)
    std_a = 1.414 * (2.0 / (2 * F_OUT + 1)) ** 0.5
    attn = std_a * jax.random.normal(k_a, (1, 2 * F_OUT), dtype=jnp.float32)

    # Sparse adjacency pattern passed as a bool mask (no O(N^2) f32 wrapper
    # traffic), with self-loops so every row has at least one edge.
    adj = jax.random.uniform(k_adj, (N, N)) < 0.05
    adj = adj | jnp.eye(N, dtype=bool)

    ref = _reference(x, adj, W, attn, ALPHA)

    # f32-operand path: same math as the reference up to tiled accumulation
    # order and the EUP approximate reciprocal.
    out_f32 = jax.block_until_ready(
        sparse_gat_layer(x, adj, W, attn, ALPHA, matmul_dtype=jnp.float32))
    assert out_f32.shape == (N, F_OUT)
    assert jnp.allclose(out_f32, ref, atol=1e-2, rtol=1e-2), (
        f"f32 kernel mismatch vs reference, max|err|={jnp.max(jnp.abs(out_f32 - ref)):.3e}")

    # bf16-operand path (default, fast): bf16 rounding of the matmul operands is
    # amplified through exp() in the attention weights, so the tolerance is
    # looser; f32 accumulation keeps the error bounded.
    out = jax.block_until_ready(sparse_gat_layer(x, adj, W, attn, ALPHA))
    assert out.shape == (N, F_OUT)
    assert jnp.allclose(out, ref, atol=7.5e-2, rtol=5e-2), (
        f"bf16 kernel mismatch vs reference, max|err|={jnp.max(jnp.abs(out - ref)):.3e}")

    print("KERNEL_OK")
</pallas_src>

<mosaic_0001>
module attributes {stable_mosaic.version = 11 : i64} {
  func.func @_project_kernel(%arg0: i32, %arg1: memref<256x128xf32, #tpu.memory_space<vmem>>, %arg2: memref<128x128xf32, #tpu.memory_space<vmem>>, %arg3: memref<1x128xf32, #tpu.memory_space<vmem>>, %arg4: memref<1x128xf32, #tpu.memory_space<vmem>>, %arg5: memref<256x128xf32, #tpu.memory_space<vmem>>, %arg6: memref<256x1xf32, #tpu.memory_space<vmem>>, %arg7: memref<256x1xf32, #tpu.memory_space<vmem>>) attributes {dimension_semantics = [#tpu.dimension_semantics<parallel>], iteration_bounds = array<i64: 2>, scalar_prefetch = 0 : i64, scratch_operands = 0 : i64, tpu.core_type = #tpu.core_type<tc>, window_params = [{transform_indices = @transform_0, window_bounds = array<i64: 256, 128>}, {pipeline_mode = #tpu.pipeline_mode<synchronous>, transform_indices = @transform_1, window_bounds = array<i64: 128, 128>}, {pipeline_mode = #tpu.pipeline_mode<synchronous>, transform_indices = @transform_2, window_bounds = array<i64: 1, 128>}, {pipeline_mode = #tpu.pipeline_mode<synchronous>, transform_indices = @transform_3, window_bounds = array<i64: 1, 128>}, {transform_indices = @transform_4, window_bounds = array<i64: 256, 128>}, {transform_indices = @transform_5, window_bounds = array<i64: 256, 1>}, {transform_indices = @transform_6, window_bounds = array<i64: 256, 1>}]} {
    %c0 = arith.constant 0 : index
    %c0_0 = arith.constant 0 : index
    %0 = vector.load %arg1[%c0, %c0_0] : memref<256x128xf32, #tpu.memory_space<vmem>>, vector<256x128xf32>
    %c0_1 = arith.constant 0 : index
    %c0_2 = arith.constant 0 : index
    %1 = vector.load %arg2[%c0_1, %c0_2] : memref<128x128xf32, #tpu.memory_space<vmem>>, vector<128x128xf32>
    %cst = arith.constant dense<0.000000e+00> : vector<256x128xf32>
    %2 = tpu.matmul %0, %1, %cst {dimension_numbers = #tpu.dot_dimension_numbers<[1], [0], [0], [1], [0, 0, 1, 1], [], []>} : vector<256x128xf32>, vector<128x128xf32>, vector<256x128xf32> -> vector<256x128xf32>
    %c0_3 = arith.constant 0 : index
    %c0_4 = arith.constant 0 : index
    %3 = vector.load %arg5[%c0_3, %c0_4] : memref<256x128xf32, #tpu.memory_space<vmem>>, vector<256x128xf32>
    tpu.vector_store %arg5[%c0_3, %c0_4], %2 {strides = array<i32>} : memref<256x128xf32, #tpu.memory_space<vmem>>, vector<256x128xf32>,
    %c0_5 = arith.constant 0 : index
    %c0_6 = arith.constant 0 : index
    %4 = vector.load %arg3[%c0_5, %c0_6] : memref<1x128xf32, #tpu.memory_space<vmem>>, vector<1x128xf32>
    %5 = vector.broadcast %4 : vector<1x128xf32> to vector<256x128xf32>
    %6 = arith.mulf %2, %5 : vector<256x128xf32>
    %cst_7 = arith.constant dense<0.000000e+00> : vector<256xf32>
    %7 = vector.multi_reduction <add>, %6, %cst_7 [1] : vector<256x128xf32> to vector<256xf32>
    %8 = vector.shape_cast %7 : vector<256xf32> to vector<256x1xf32>
    %c0_8 = arith.constant 0 : index
    %c0_9 = arith.constant 0 : index
    %9 = vector.load %arg6[%c0_8, %c0_9] : memref<256x1xf32, #tpu.memory_space<vmem>>, vector<256x1xf32>
    tpu.vector_store %arg6[%c0_8, %c0_9], %8 {strides = array<i32>} : memref<256x1xf32, #tpu.memory_space<vmem>>, vector<256x1xf32>,
    %c0_10 = arith.constant 0 : index
    %c0_11 = arith.constant 0 : index
    %10 = vector.load %arg4[%c0_10, %c0_11] : memref<1x128xf32, #tpu.memory_space<vmem>>, vector<1x128xf32>
    %11 = vector.broadcast %10 : vector<1x128xf32> to vector<256x128xf32>
    %12 = arith.mulf %2, %11 : vector<256x128xf32>
    %cst_12 = arith.constant dense<0.000000e+00> : vector<256xf32>
    %13 = vector.multi_reduction <add>, %12, %cst_12 [1] : vector<256x128xf32> to vector<256xf32>
    %14 = vector.shape_cast %13 : vector<256xf32> to vector<256x1xf32>
    %c0_13 = arith.constant 0 : index
    %c0_14 = arith.constant 0 : index
    %15 = vector.load %arg7[%c0_13, %c0_14] : memref<256x1xf32, #tpu.memory_space<vmem>>, vector<256x1xf32>
    tpu.vector_store %arg7[%c0_13, %c0_14], %14 {strides = array<i32>} : memref<256x1xf32, #tpu.memory_space<vmem>>, vector<256x1xf32>,
    return
  }
  func.func @transform_0(%arg0: i32) -> (i32, i32) {
    %c0_i32 = arith.constant 0 : i32
    %c0_i32_0 = arith.constant 0 : i32
    return %arg0, %c0_i32 : i32, i32
  }
  func.func @transform_1(%arg0: i32) -> (i32, i32) {
    %c0_i32 = arith.constant 0 : i32
    %c0_i32_0 = arith.constant 0 : i32
    %c0_i32_1 = arith.constant 0 : i32
    return %c0_i32, %c0_i32_0 : i32, i32
  }
  func.func @transform_2(%arg0: i32) -> (i32, i32) {
    %c0_i32 = arith.constant 0 : i32
    %c0_i32_0 = arith.constant 0 : i32
    %c0_i32_1 = arith.constant 0 : i32
    return %c0_i32, %c0_i32_0 : i32, i32
  }
  func.func @transform_3(%arg0: i32) -> (i32, i32) {
    %c0_i32 = arith.constant 0 : i32
    %c0_i32_0 = arith.constant 0 : i32
    %c0_i32_1 = arith.constant 0 : i32
    return %c0_i32, %c0_i32_0 : i32, i32
  }
  func.func @transform_4(%arg0: i32) -> (i32, i32) {
    %c0_i32 = arith.constant 0 : i32
    %c0_i32_0 = arith.constant 0 : i32
    return %arg0, %c0_i32 : i32, i32
  }
  func.func @transform_5(%arg0: i32) -> (i32, i32) {
    %c0_i32 = arith.constant 0 : i32
    %c0_i32_0 = arith.constant 0 : i32
    return %arg0, %c0_i32 : i32, i32
  }
  func.func @transform_6(%arg0: i32) -> (i32, i32) {
    %c0_i32 = arith.constant 0 : i32
    %c0_i32_0 = arith.constant 0 : i32
    return %arg0, %c0_i32 : i32, i32
  }
}

</mosaic_0001>

<bundles_post_ra>
// kernel: tpu_custom_call.1
= control target key start
LH: loop header
LB: loop body
LE: loop exit
PB: predicated region body
PF: predicated region fallthrough
CT: control target
= control target key end

     0   :  { %12 = vsyncpa [#allocation3], 0  ;;  %s2136_s0 = inlined_call_operand.hbm [shape: f32[512,128], index: 0, kind: input, shape index: {}]   ;;  %s2137_s1 = inlined_call_operand.hbm [shape: f32[128,128], index: 1, kind: input, shape index: {}]   ;;  %s2138_s2 = inlined_call_operand.vmem [shape: f32[1,128], index: 2, kind: input, shape index: {}]   ;;  %s2139_s3 = inlined_call_operand.vmem [shape: f32[1,128], index: 3, kind: input, shape index: {}]   ;;  %s2140_s4 = inlined_call_operand.hbm [shape: f32[512,128], index: 4, kind: output, shape index: {0}]   ;;  %s2141_s5 = inlined_call_operand.vmem [shape: f32[512,1], index: 5, kind: output, shape index: {1}]   ;;  %s2142_s6 = inlined_call_operand.vmem [shape: f32[512,1], index: 6, kind: output, shape index: {2}]  }
   0x1   :  { %14 = vsyncpa [#allocation3 + $0x1], 0 }
   0x2   :  { %15 = vsyncpa [#allocation6], 0 }
   0x3   :  { %16 = vsyncpa [#allocation4], 0 }
   0x4   :  { %18 = vsyncpa [#allocation4 + $0x1], 0  ;;  %s1488_s21 = smov 0   ;;  %s1490_s22 = smov 0  }
   0x5   :  { %s1492_s23 = smov 0   ;;  %s1494_s24 = smov 0  }
   0x6 LB: > { %s1509_s25 = sadd.s32 4294967295, %s1444_s24   ;;  %s1055_s26 = sadd.s32 4294967294, %s1444_s24   ;;  %s1444_s24 = sphi %s1494_s24, %s2162_s24   ;;  %s1440_s23 = sphi %s1492_s23, %s2161_s23   ;;  %s1436_s22 = sphi %s1490_s22, %s2160_s22   ;;  %s1432_s21 = sphi %s1488_s21, %s2159_s21  }
   0x7   : > { %p44_p0 = scmp.ne.s32.totalorder %s1436_s22, %s1432_s21  ;;  %p2143_p1 = scmp.eq.s32.totalorder %s1509_s25, 0 }
   0x8   : > { %p137_p3 = scmp.eq.s32.totalorder %s1055_s26, 1  ;;  %p1056_p5 = scmp.ge.s32.totalorder %s1444_s24, 1 }
   0x9   : > { %p1518_p4 = por %p2143_p1, %p44_p0  ;;  %p196_p7 = scmp.lt.s32.totalorder %s1444_s24, 3 }
   0xa   : > { %p1523_p6 = por %p137_p3, %p44_p0  ;;  %s1446_s30 = smov [#allocation5]  }
   0xb   : > { %s2146_s27 = scalar_select %p1518_p4, 1, 0 }
   0xc   : > { %s2147_s28 = scalar_select %p1523_p6, 1, 0 }
   0xd   : > { %p1528_p8 = pnand %p1056_p5, %p196_p7  ;;  %s208_s7 = sshll.u32 %s1446_s30, 4  ;;  %s1532_s7 = int_to_ptr.vmem [resolvable:$true] %s208_s7 }
   0xe   : > { %s1544_s9 = sadd.s32 1, %s1444_s24   ;;  %s31_s10 = sadd.s32 1, %s1440_s23 }
   0xf   : > { %s2148_s29 = scalar_select %p1528_p8, 1, 0 }
  0x10   : > { %p1263_p9 = pneg %p1528_p8  ;;  %s28_s11 = ssub.s32 %s1444_s24, %s1544_s9 }
  0x11   : > { %s1316_s14 = scalar_lea.hbm %s2137_s1, 2048 }
  0x12   : > { %p1539_p11 = pnand %p1263_p9, %p2143_p1  ;;  %p1317_p12 = scmp.ne.s32.totalorder %s2137_s1, %s1316_s14 }
  0x13   : > { %p1323_p5 = scmp.lt.u32.totalorder %s1316_s14, %s2137_s1 }
  0x14   : > { %p1318_p13 = pneg %p1539_p11 }
  0x16   : > { %p1319_p0 = pnand %p1318_p13, %p1317_p12 }
  0x18   : > { %p1320_p3 = pneg %p1319_p0 }
  0x1a   : > { %p1325_p7 = pnand %p1323_p5, %p1320_p3 }
  0x1c   : > { %1328 = shalt.err (!%p1325_p7)
}
  0x1d   : > { %s1329_s19 = scalar_lea.vmem %s1532_s7, 2048  ;;  %p1337_p2 = scmp.lt.s32.totalorder %s1532_s7, %s1532_s7 }
  0x1e   : > { %p1330_p9 = scmp.ne.s32.totalorder %s1532_s7, %s1329_s19  ;;  %p1338_p6 = scmp.lt.s32.totalorder %s1329_s19, %s1329_s19 }
  0x20   : > { %p1332_p10 = pnand %p1330_p9, %p1318_p13  ;;  %p1339_p4 = por %p1338_p6, %p1337_p2 }
  0x22   : > { %p1333_p1 = pneg %p1332_p10 }
  0x24   : > { %p1340_p8 = pnand %p1339_p4, %p1333_p1 }
  0x26   : > { %1343 = shalt.err (!%p1340_p8)
}
  0x27   : > { %s1447_s20 = smov 128   ;;  %s1448_s26 = smov 8  }
  0x28   : > { %1266 = dma.hbm_to_vmem [thread:$0]  (!%p1539_p11), %s2137_s1, 2048, %s1532_s7, [#allocation6], %s1447_s20, %s1447_s20, %s1448_s26  }
  0x29   : > { %p29_p1 = scmp.eq.s32.totalorder %s28_s11, 0  ;;  %p38_p2 = scmp.ne.s32.totalorder %s1440_s23, %s1436_s22 }
  0x2a   : > { %p39_p4 = scmp.eq.s32.totalorder %s1444_s24, 0  ;;  %p1276_p6 = scmp.lt.s32.totalorder %s1444_s24, 2 }
  0x2b   : > { %s1578_s13 = scalar_select %p29_p1, %s1440_s23, %s31_s10  }
  0x2c   : > { %p40_p8 = por %p39_p4, %p38_p2  ;;  %p2150_p10 = scmp.eq.s32.totalorder %s1509_s25, 1 }
  0x2d   : > { %s228_s8 = sand.u32 1, %s1440_s23   ;;  %s1077_s15 = sshll.u32 %s1444_s24, 12 }
  0x2e   : > { %p1582_p12 = por %p2150_p10, %p38_p2  ;;  %s1059_s16 = sshll.u32 %s228_s8, 8 }
  0x2f   : > { %s1591_s19 = scalar_lea.hbm %s2136_s0, %s1077_s15  ;;  %s232_s7 = scalar_lea.vmem [#allocation2], %s1059_s16 }
  0x30   : > { %s239_s10 = sshll.u32 %s232_s7, 4  ;;  %p1593_p11 = pnand %p1276_p6, %p40_p8  ;;  %s1597_s10 = int_to_ptr.vmem [resolvable:$true] %s239_s10 }
  0x31   : > { %s1599_s30 = scalar_lea.sflag [#allocation3], %s228_s8  ;;  %s1344_s12 = scalar_lea.hbm %s1591_s19, 4096 }
  0x32   : > { %p1345_p13 = scmp.ne.s32.totalorder %s1591_s19, %s1344_s12  ;;  %p1346_p0 = pneg %p1593_p11 }
  0x33   : > { %s1349_s17 = scalar_lea.hbm %s2136_s0, 8192  ;;  %p1350_p7 = scmp.lt.u32.totalorder %s1591_s19, %s2136_s0 }
  0x34   : > { %p1347_p3 = pnand %p1346_p0, %p1345_p13  ;;  %p1351_p9 = scmp.lt.u32.totalorder %s1349_s17, %s1344_s12 }
  0x35   : > { %p1353_p2 = scmp.lt.u32.totalorder %s1344_s12, %s1591_s19 }
  0x36   : > { %p1348_p5 = pneg %p1347_p3  ;;  %p1352_p1 = por %p1351_p9, %p1350_p7 }
  0x38   : > { %p1354_p4 = por %p1353_p2, %p1352_p1 }
  0x3a   : > { %p1355_p6 = pnand %p1354_p4, %p1348_p5 }
  0x3c   : > { %1358 = shalt.err (!%p1355_p6)
}
  0x3d   : > { %s1359_s8 = scalar_lea.vmem %s1597_s10, 4096  ;;  %s1449_s15 = smov [#allocation2]  }
  0x3e   : > { %p1360_p8 = scmp.ne.s32.totalorder %s1597_s10, %s1359_s8  ;;  %s1364_s16 = sshll.u32 %s1449_s15, 4  ;;  %s1365_s16 = int_to_ptr.vmem [resolvable:$false] %s1364_s16 }
  0x3f   : > { %s1366_s18 = scalar_lea.vmem %s1365_s16, 8192  ;;  %p1367_p3 = scmp.lt.s32.totalorder %s1597_s10, %s1365_s16 }
  0x40   : > { %p1362_p10 = pnand %p1360_p8, %p1346_p0  ;;  %p1368_p7 = scmp.lt.s32.totalorder %s1366_s18, %s1359_s8 }
  0x42   : > { %p1363_p13 = pneg %p1362_p10  ;;  %p1369_p9 = por %p1368_p7, %p1367_p3 }
  0x44   : > { %p1370_p1 = pnand %p1369_p9, %p1363_p13 }
  0x46   : > { %1373 = shalt.err (!%p1370_p1)
}
  0x47   : > { %1270 = dma.hbm_to_vmem [thread:$0]  (!%p1593_p11), %s1591_s19, 4096, %s1597_s10, %s1599_s30, %s1447_s20, %s1447_s20, %s1448_s26  }
  0x48   : > { %p2153_p0 = scmp.ne.s32.totalorder %s2148_s29, 0 }
  0x49   : > { %s1633_s12 = sand.u32 (!%p2153_p0), 1, %s1436_s22   ;;  %p2154_p5 = scmp.ne.s32.totalorder (!%p2153_p0), %s2146_s27, 0 }
  0x4a   : > { %251 = sbr.rel (%p2153_p0) target bundleno = 601 (0x259), region = 36  ;;  %s1063_s17 = sshll.u32 (!%p2153_p0), %s1633_s12, 8 }
  0x4b   : > { %s254_s7 = scalar_lea.sflag (!%p2153_p0), [#allocation3], %s1633_s12  ;;  %s1639_s11 = scalar_lea.vmem (!%p2153_p0), [#allocation2], %s1063_s17 }
  0x51   : > { %1419 = dma.done.wait (%p2154_p5), %s254_s7, 4096  }
  0x52   : > { %1421 = vsyncadd (%p2154_p5), %s254_s7, 4294963200  ;;  %p2155_p11 = scmp.eq.s32.totalorder %s1509_s25, 0 }
  0x54   : > { %1423 = dma.done.wait (%p2155_p11), [#allocation6], 2048   ;;  %p2156_p2 = pmov %p2155_p11 }
  0x55   : > { %v346_v0 = vld [vmem:[#allocation5] sm:$0xff]  ;;  %v347_v1 = vld [vmem:[#allocation5 + $0x8] sm:$0xff]  ;;  %v348_v2 = vld [vmem:[#allocation5 + $0x10] sm:$0xff]  ;;  %s1688_s20 = scalar_lea.vmem [#allocation7], %s1063_s17  ;;  %s1066_s10 = sshll.u32 %s1509_s25, 5  ;;  %vm722_vm0 = vcmask 7168  }
  0x56   : > { %1425 = vsyncadd (%p2156_p2), [#allocation6], 4294965248  ;;  %v1207_v3 = vpack.c.bf16 %v347_v1, %v346_v0  ;;  %v349_v4 = vld [vmem:[#allocation5 + $0x18] sm:$0xff]  ;;  %v350_v6 = vld [vmem:[#allocation5 + $0x20] sm:$0xff]  ;;  %p303_p4 = scmp.lt.s32.totalorder %s1066_s10, 63  ;;  %s1078_s8 = sshll.u32 %s1509_s25, 12 }
  0x57   : > { %v1211_v5 = vpack.c.bf16 %v349_v4, %v348_v2  ;;  %v351_v7 = vld [vmem:[#allocation5 + $0x28] sm:$0xff]  ;;  %v314_v9 = vld [vmem:[%s1639_s11] sm:$0xff]  ;;  %v352_v11 = vld [vmem:[#allocation5 + $0x30] sm:$0xff]  ;;  %s914_s15 = sshll.u32 %s1688_s20, 4  ;;  %s1948_s17 = scalar_lea.hbm %s2140_s4, %s1078_s8  ;;  %s1950_s15 = int_to_ptr.vmem [resolvable:$true] %s914_s15 }
  0x58   : > { %1208 = vmatprep.subr.bf16.mxu0 %v1207_v3  ;;  %1239 = vmatprep.subr.bf16.mxu1 %v1207_v3  ;;  %v1215_v8 = vpack.c.bf16 %v351_v7, %v350_v6  ;;  %v330_v10 = vld [vmem:[%s1639_s11 + $0x80] sm:$0xff]  ;;  %v353_v12 = vld [vmem:[#allocation5 + $0x38] sm:$0xff]  ;;  %v355_v15 = vld [vmem:[#allocation5 + $0x48] sm:$0xff]  ;;  %s2164_s10 = smov (!%p303_p4, %s1066_s10), 63  ;;  %s891_s29 = scalar_lea.sflag [#allocation4], %s1633_s12 }
  0x59   : > { %1210 = vmatpush3.bf16.msra.mxu0 %v1207_v3  ;;  %1247 = vmatpush3.bf16.msra.mxu1 %v1207_v3  ;;  %v1219_v13 = vpack.c.bf16 %v353_v12, %v352_v11  ;;  %v354_v14 = vld [vmem:[#allocation5 + $0x40] sm:$0xff]  ;;  %v356_v17 = vld [vmem:[#allocation5 + $0x50] sm:$0xff]  ;;  %v357_v18 = vld [vmem:[#allocation5 + $0x58] sm:$0xff]  ;;  %s1067_s30 = sshll.u32 %s2164_s10, 3  ;;  %s1374_s25 = scalar_lea.vmem %s1950_s15, 4096 }
  0x5a   : > { %1212 = vmatprep.subr.bf16.mxu0 %v1211_v5  ;;  %1240 = vmatprep.subr.bf16.mxu1 %v1211_v5  ;;  %v1223_v16 = vpack.c.bf16 %v355_v15, %v354_v14  ;;  %v1227_v19 = vpack.c.bf16 %v357_v18, %v356_v17  ;;  %v358_v20 = vld [vmem:[#allocation5 + $0x60] sm:$0xff]  ;;  %v359_v21 = vld [vmem:[#allocation5 + $0x68] sm:$0xff]  ;;  %v360_v23 = vld [vmem:[#allocation5 + $0x70] sm:$0xff]  ;;  %s1957_s27 = scalar_lea.vmem %s2141_s5, %s1067_s30  ;;  %p1375_p6 = scmp.ne.s32.totalorder %s1950_s15, %s1374_s25 }
  0x5b   : > { %1159 = vmatprep.mubr.f32.mxu0 %v314_v9  ;;  %1183 = vmatprep.mubr.f32.mxu1 %v330_v10  ;;  %v1231_v22 = vpack.c.bf16 %v359_v21, %v358_v20  ;;  %v361_v24 = vld [vmem:[#allocation5 + $0x78] sm:$0xff]  ;;  %v315_v26 = vld [vmem:[%s1639_s11 + $0x8] sm:$0xff]  ;;  %v316_v28 = vld [vmem:[%s1639_s11 + $0x10] sm:$0xff] }
  0x5c   : > { %v1235_v25 = vpack.c.bf16 %v361_v24, %v360_v23  ;;  %v331_v27 = vld [vmem:[%s1639_s11 + $0x88] sm:$0xff]  ;;  %v332_v29 = vld [vmem:[%s1639_s11 + $0x90] sm:$0xff]  ;;  %v317_v30 = vld [vmem:[%s1639_s11 + $0x18] sm:$0xff]  ;;  %p1376_p8 = pnand %p1375_p6, %p1582_p12 }
  0x5d   : > { %1214 = vmatpush3.bf16.msra.mxu0 %v1211_v5  ;;  %1248 = vmatpush3.bf16.msra.mxu1 %v1211_v5  ;;  %v333_v31 = vld [vmem:[%s1639_s11 + $0x98] sm:$0xff]  ;;  %v318_v32 = vld [vmem:[%s1639_s11 + $0x20] sm:$0xff]  ;;  %v319_v34 = vld [vmem:[%s1639_s11 + $0x28] sm:$0xff] }
  0x5e   : > { %1216 = vmatprep.subr.bf16.mxu0 %v1215_v8  ;;  %1241 = vmatprep.subr.bf16.mxu1 %v1215_v8  ;;  %v334_v33 = vld [vmem:[%s1639_s11 + $0xa0] sm:$0xff]  ;;  %v335_v35 = vld [vmem:[%s1639_s11 + $0xa8] sm:$0xff]  ;;  %v320_v36 = vld [vmem:[%s1639_s11 + $0x30] sm:$0xff]  ;;  %p1377_p10 = pneg %p1376_p8 }
  0x5f   : > { %v336_v37 = vld [vmem:[%s1639_s11 + $0xb0] sm:$0xff]  ;;  %v321_v38 = vld [vmem:[%s1639_s11 + $0x38] sm:$0xff]  ;;  %v322_v40 = vld [vmem:[%s1639_s11 + $0x40] sm:$0xff] }
  0x60   : > { %v337_v39 = vld [vmem:[%s1639_s11 + $0xb8] sm:$0xff]  ;;  %v338_v41 = vld [vmem:[%s1639_s11 + $0xc0] sm:$0xff]  ;;  %v323_v42 = vld [vmem:[%s1639_s11 + $0x48] sm:$0xff] }
  0x61   : > { %1218 = vmatpush3.bf16.msra.mxu0 %v1215_v8  ;;  %1249 = vmatpush3.bf16.msra.mxu1 %v1215_v8  ;;  %v339_v43 = vld [vmem:[%s1639_s11 + $0xc8] sm:$0xff]  ;;  %v324_v44 = vld [vmem:[%s1639_s11 + $0x50] sm:$0xff]  ;;  %v325_v46 = vld [vmem:[%s1639_s11 + $0x58] sm:$0xff] }
  0x62   : > { %1220 = vmatprep.subr.bf16.mxu0 %v1219_v13  ;;  %1242 = vmatprep.subr.bf16.mxu1 %v1219_v13  ;;  %v340_v45 = vld [vmem:[%s1639_s11 + $0xd0] sm:$0xff]  ;;  %v341_v47 = vld [vmem:[%s1639_s11 + $0xd8] sm:$0xff]  ;;  %v326_v48 = vld [vmem:[%s1639_s11 + $0x60] sm:$0xff] }
  0x63   : > { %v342_v49 = vld [vmem:[%s1639_s11 + $0xe0] sm:$0xff]  ;;  %v327_v50 = vld [vmem:[%s1639_s11 + $0x68] sm:$0xff]  ;;  %v328_v52 = vld [vmem:[%s1639_s11 + $0x70] sm:$0xff] }
  0x64   : > { %v343_v51 = vld [vmem:[%s1639_s11 + $0xe8] sm:$0xff]  ;;  %v344_v53 = vld [vmem:[%s1639_s11 + $0xf0] sm:$0xff]  ;;  %v329_v54 = vld [vmem:[%s1639_s11 + $0x78] sm:$0xff] }
  0x65   : > { %1222 = vmatpush3.bf16.msra.mxu0 %v1219_v13  ;;  %1250 = vmatpush3.bf16.msra.mxu1 %v1219_v13  ;;  %v345_v55 = vld [vmem:[%s1639_s11 + $0xf8] sm:$0xff]  ;;  %v1684_v56 = vld [vmem:[%s2138_s2] ss:$0 sm:$0xff] }
  0x66   : > { %1224 = vmatprep.subr.bf16.mxu0 %v1223_v16  ;;  %1243 = vmatprep.subr.bf16.mxu1 %v1223_v16  ;;  %v1699_v63 = vld [vmem:[%s2139_s3] ss:$0 sm:$0xff] }
  0x69   : > { %1226 = vmatpush3.bf16.msra.mxu0 %v1223_v16  ;;  %1251 = vmatpush3.bf16.msra.mxu1 %v1223_v16 }
  0x6a   : > { %1228 = vmatprep.subr.bf16.mxu0 %v1227_v19  ;;  %1244 = vmatprep.subr.bf16.mxu1 %v1227_v19 }
  0x6d   : > { %1230 = vmatpush3.bf16.msra.mxu0 %v1227_v19  ;;  %1252 = vmatpush3.bf16.msra.mxu1 %v1227_v19 }
  0x6e   : > { %1232 = vmatprep.subr.bf16.mxu0 %v1231_v22  ;;  %1245 = vmatprep.subr.bf16.mxu1 %v1231_v22 }
  0x71   : > { %1234 = vmatpush3.bf16.msra.mxu0 %v1231_v22  ;;  %1253 = vmatpush3.bf16.msra.mxu1 %v1231_v22 }
  0x72   : > { %1236 = vmatprep.subr.bf16.mxu0 %v1235_v25  ;;  %1246 = vmatprep.subr.bf16.mxu1 %v1235_v25 }
  0x75   : > { %1238 = vmatpush3.bf16.msra.mxu0 %v1235_v25  ;;  %1254 = vmatpush3.bf16.msra.mxu1 %v1235_v25 }
  0x78   : > { %1160 = vmatmul.mubr.f32.vlgmr.msra.gmra.mrb[0].mxu0 %v315_v26  ;;  %1184 = vmatmul.mubr.f32.vlgmr.msra.gmra.mrb[0].mxu1 %v331_v27 }
  0x79   : > { %1162 = vmatprep.mubr.f32.mxu0 %v316_v28  ;;  %1186 = vmatprep.mubr.f32.mxu1 %v332_v29 }
  0x7c   : > { %1163 = vmatmul.mubr.f32.gmra.mrb[2].mxu0 %v317_v30  ;;  %1187 = vmatmul.mubr.f32.gmra.mrb[2].mxu1 %v333_v31 }
  0x7d   : > { %1165 = vmatprep.mubr.f32.mxu0 %v318_v32  ;;  %1189 = vmatprep.mubr.f32.mxu1 %v334_v33 }
  0x80   : > { %1166 = vmatmul.mubr.f32.gmra.mrb[4].mxu0 %v319_v34  ;;  %1190 = vmatmul.mubr.f32.gmra.mrb[4].mxu1 %v335_v35 }
  0x81   : > { %1168 = vmatprep.mubr.f32.mxu0 %v320_v36  ;;  %1192 = vmatprep.mubr.f32.mxu1 %v336_v37 }
  0x84   : > { %1169 = vmatmul.mubr.f32.gmra.mrb[6].mxu0 %v321_v38  ;;  %1193 = vmatmul.mubr.f32.gmra.mrb[6].mxu1 %v337_v39 }
  0x85   : > { %1171 = vmatprep.mubr.f32.mxu0 %v322_v40  ;;  %1195 = vmatprep.mubr.f32.mxu1 %v338_v41 }
  0x88   : > { %1172 = vmatmul.mubr.f32.gmra.mrb[8].mxu0 %v323_v42  ;;  %1196 = vmatmul.mubr.f32.gmra.mrb[8].mxu1 %v339_v43 }
  0x89   : > { %1174 = vmatprep.mubr.f32.mxu0 %v324_v44  ;;  %1198 = vmatprep.mubr.f32.mxu1 %v340_v45 }
  0x8c   : > { %1175 = vmatmul.mubr.f32.gmra.mrb[10].mxu0 %v325_v46  ;;  %1199 = vmatmul.mubr.f32.gmra.mrb[10].mxu1 %v341_v47 }
  0x8d   : > { %1177 = vmatprep.mubr.f32.mxu0 %v326_v48  ;;  %1201 = vmatprep.mubr.f32.mxu1 %v342_v49 }
  0x90   : > { %1178 = vmatmul.mubr.f32.gmra.mrb[12].mxu0 %v327_v50  ;;  %1202 = vmatmul.mubr.f32.gmra.mrb[12].mxu1 %v343_v51 }
  0x91   : > { %1180 = vmatprep.mubr.f32.mxu0 %v328_v52  ;;  %1204 = vmatprep.mubr.f32.mxu1 %v344_v53 }
  0x94   : > { %1181 = vmatmul.mubr.f32.gmra.mrb[14].mxu0 %v329_v54  ;;  %1205 = vmatmul.mubr.f32.gmra.mrb[14].mxu1 %v345_v55 }
 0x14b   : > { %v1161_v57 = vpop.f32.mrb[0].mxu0  ;;  %v1185_v58 = vpop.f32.mrb[0].mxu1 }
 0x14c   : > { %588 = vst [vmem:[%s1688_s20 + $0x8] sm:$0xff] %v1161_v57  ;;  %604 = vst [vmem:[%s1688_s20 + $0x88] sm:$0xff] %v1185_v58  ;;  %v428_v59 = vpop.f32.mrb[1].mxu0  ;;  %v508_v60 = vpop.f32.mrb[1].mxu1  ;;  %v643_v61 = vmul.f32 %v1185_v58, %v1684_v56  ;;  %v627_v62 = vmul.f32 %v1161_v57, %v1684_v56  ;;  %v763_v2 = vmul.f32 %v1161_v57, %v1699_v63 }
 0x14d   : > { %587 = vst [vmem:[%s1688_s20] sm:$0xff] %v428_v59  ;;  %603 = vst [vmem:[%s1688_s20 + $0x80] sm:$0xff] %v508_v60  ;;  %v626_v3 = vmul.f32 %v1684_v56, %v428_v59  ;;  %v779_v8 = vmul.f32 %v1185_v58, %v1699_v63  ;;  %v642_v9 = vmul.f32 %v1684_v56, %v508_v60 }
 0x14e   : > { %692 = vadd.xlane.f32.xlu1 %v643_v61  ;;  %660 = vadd.xlane.f32.xlu0 %v627_v62  ;;  %v762_v15 = vmul.f32 %v1699_v63, %v428_v59  ;;  %v778_v19 = vmul.f32 %v1699_v63, %v508_v60 }
 0x14f   : > { %v1164_v0 = vpop.f32.mrb[2].mxu0  ;;  %v1701_v1 = vpop.f32.mrb[2].mxu1 }
 0x150   : > { %590 = vst [vmem:[%s1688_s20 + $0x18] sm:$0xff] %v1164_v0  ;;  %v1706_v4 = vpop.f32.mrb[3].mxu0  ;;  %606 = vst [vmem:[%s1688_s20 + $0x98] sm:$0xff] %v1701_v1  ;;  %v1710_v5 = vpop.f32.mrb[3].mxu1  ;;  %v629_v12 = vmul.f32 %v1164_v0, %v1684_v56  ;;  %v645_v18 = vmul.f32 %v1701_v1, %v1684_v56  ;;  %v765_v33 = vmul.f32 %v1164_v0, %v1699_v63 }
 0x151   : > { %589 = vst [vmem:[%s1688_s20 + $0x10] sm:$0xff] %v1706_v4  ;;  %605 = vst [vmem:[%s1688_s20 + $0x90] sm:$0xff] %v1710_v5  ;;  %v644_v32 = vmul.f32 %v1684_v56, %v1710_v5  ;;  %v781_v46 = vmul.f32 %v1701_v1, %v1699_v63  ;;  %v764_v47 = vmul.f32 %v1699_v63, %v1706_v4 }
 0x152   : > { %796 = vadd.xlane.f32.xlu1 %v763_v2  ;;  %658 = vadd.xlane.f32.xlu0 %v626_v3  ;;  %v780_v61 = vmul.f32 %v1699_v63, %v1710_v5  ;;  %v628_v62 = vmul.f32 %v1684_v56, %v1706_v4 }
 0x153   : > { %v1716_v6 = vpop.f32.mrb[4].mxu0  ;;  %v1718_v7 = vpop.f32.mrb[4].mxu1 }
 0x154   : > { %592 = vst [vmem:[%s1688_s20 + $0x28] sm:$0xff] %v1716_v6  ;;  %v1724_v10 = vpop.f32.mrb[5].mxu0  ;;  %608 = vst [vmem:[%s1688_s20 + $0xa8] sm:$0xff] %v1718_v7  ;;  %v1728_v11 = vpop.f32.mrb[5].mxu1 }
 0x155   : > { %591 = vst [vmem:[%s1688_s20 + $0x20] sm:$0xff] %v1724_v10  ;;  %607 = vst [vmem:[%s1688_s20 + $0xa0] sm:$0xff] %v1728_v11 }
 0x156   : > { %828 = vadd.xlane.f32.xlu1 %v779_v8  ;;  %690 = vadd.xlane.f32.xlu0 %v642_v9 }
 0x157   : > { %v1735_v13 = vpop.f32.mrb[6].mxu0  ;;  %v1737_v14 = vpop.f32.mrb[6].mxu1 }
 0x158   : > { %594 = vst [vmem:[%s1688_s20 + $0x38] sm:$0xff] %v1735_v13  ;;  %v1742_v16 = vpop.f32.mrb[7].mxu0  ;;  %610 = vst [vmem:[%s1688_s20 + $0xb8] sm:$0xff] %v1737_v14  ;;  %v1746_v17 = vpop.f32.mrb[7].mxu1 }
 0x159   : > { %593 = vst [vmem:[%s1688_s20 + $0x30] sm:$0xff] %v1742_v16  ;;  %609 = vst [vmem:[%s1688_s20 + $0xb0] sm:$0xff] %v1746_v17 }
 0x15a   : > { %794 = vadd.xlane.f32.xlu0 %v762_v15  ;;  %664 = vadd.xlane.f32.xlu1 %v629_v12 }
 0x15b   : > { %v1173_v20 = vpop.f32.mrb[8].mxu0  ;;  %v1197_v21 = vpop.f32.mrb[8].mxu1 }
 0x15c   : > { %596 = vst [vmem:[%s1688_s20 + $0x48] sm:$0xff] %v1173_v20  ;;  %v468_v22 = vpop.f32.mrb[9].mxu0  ;;  %612 = vst [vmem:[%s1688_s20 + $0xc8] sm:$0xff] %v1197_v21  ;;  %v548_v23 = vpop.f32.mrb[9].mxu1  ;;  %v1758_v24 = vmul.f32 %v1173_v20, %v1684_v56  ;;  %v1761_v25 = vmul.f32 %v1197_v21, %v1684_v56  ;;  %v1764_v26 = vmul.f32 %v1173_v20, %v1699_v63 }
 0x15d   : > { %v1767_v27 = vmul.f32 %v1197_v21, %v1699_v63  ;;  %595 = vst [vmem:[%s1688_s20 + $0x40] sm:$0xff] %v468_v22  ;;  %611 = vst [vmem:[%s1688_s20 + $0xc0] sm:$0xff] %v548_v23  ;;  %v1772_v28 = vmul.f32 %v1684_v56, %v468_v22  ;;  %v1775_v29 = vmul.f32 %v1684_v56, %v548_v23 }
 0x15e   : > { %v1778_v30 = vmul.f32 %v1699_v63, %v468_v22  ;;  %v1781_v31 = vmul.f32 %v1699_v63, %v548_v23  ;;  %826 = vadd.xlane.f32.xlu0 %v778_v19  ;;  %696 = vadd.xlane.f32.xlu1 %v645_v18  ;;  %v631_v20 = vmul.f32 %v1716_v6, %v1684_v56 }
 0x15f   : > { %v1176_v34 = vpop.f32.mrb[10].mxu0  ;;  %v1200_v35 = vpop.f32.mrb[10].mxu1  ;;  %v630_v21 = vmul.f32 %v1684_v56, %v1724_v10  ;;  %v647_v22 = vmul.f32 %v1718_v7, %v1684_v56  ;;  %v646_v23 = vmul.f32 %v1684_v56, %v1728_v11 }
 0x160   : > { %598 = vst [vmem:[%s1688_s20 + $0x58] sm:$0xff] %v1176_v34  ;;  %v478_v36 = vpop.f32.mrb[11].mxu0  ;;  %614 = vst [vmem:[%s1688_s20 + $0xd8] sm:$0xff] %v1200_v35  ;;  %v558_v37 = vpop.f32.mrb[11].mxu1  ;;  %v1789_v38 = vmul.f32 %v1176_v34, %v1684_v56  ;;  %v1792_v39 = vmul.f32 %v1200_v35, %v1684_v56  ;;  %v1795_v40 = vmul.f32 %v1176_v34, %v1699_v63 }
 0x161   : > { %v1798_v41 = vmul.f32 %v1200_v35, %v1699_v63  ;;  %597 = vst [vmem:[%s1688_s20 + $0x50] sm:$0xff] %v478_v36  ;;  %613 = vst [vmem:[%s1688_s20 + $0xd0] sm:$0xff] %v558_v37  ;;  %v1803_v42 = vmul.f32 %v1684_v56, %v478_v36  ;;  %v1806_v43 = vmul.f32 %v1684_v56, %v558_v37 }
 0x162   : > { %v1809_v44 = vmul.f32 %v1699_v63, %v478_v36  ;;  %v1812_v45 = vmul.f32 %v1699_v63, %v558_v37  ;;  %694 = vadd.xlane.f32.xlu0 %v644_v32  ;;  %800 = vadd.xlane.f32.xlu1 %v765_v33  ;;  %v767_v32 = vmul.f32 %v1716_v6, %v1699_v63 }
 0x163   : > { %v1179_v48 = vpop.f32.mrb[12].mxu0  ;;  %v1203_v49 = vpop.f32.mrb[12].mxu1  ;;  %v766_v33 = vmul.f32 %v1699_v63, %v1724_v10  ;;  %v783_v34 = vmul.f32 %v1718_v7, %v1699_v63  ;;  %v782_v35 = vmul.f32 %v1699_v63, %v1728_v11  ;;  %v633_v36 = vmul.f32 %v1735_v13, %v1684_v56 }
 0x164   : > { %600 = vst [vmem:[%s1688_s20 + $0x68] sm:$0xff] %v1179_v48  ;;  %v488_v50 = vpop.f32.mrb[13].mxu0  ;;  %616 = vst [vmem:[%s1688_s20 + $0xe8] sm:$0xff] %v1203_v49  ;;  %v568_v51 = vpop.f32.mrb[13].mxu1  ;;  %v1821_v52 = vmul.f32 %v1179_v48, %v1684_v56  ;;  %v1824_v53 = vmul.f32 %v1203_v49, %v1684_v56  ;;  %v1827_v54 = vmul.f32 %v1179_v48, %v1699_v63 }
 0x165   : > { %v1830_v55 = vmul.f32 %v1203_v49, %v1699_v63  ;;  %599 = vst [vmem:[%s1688_s20 + $0x60] sm:$0xff] %v488_v50  ;;  %615 = vst [vmem:[%s1688_s20 + $0xe0] sm:$0xff] %v568_v51  ;;  %v1835_v57 = vmul.f32 %v1684_v56, %v488_v50  ;;  %v1838_v58 = vmul.f32 %v1684_v56, %v568_v51 }
 0x166   : > { %v1841_v59 = vmul.f32 %v1699_v63, %v488_v50  ;;  %v1844_v60 = vmul.f32 %v1699_v63, %v568_v51  ;;  %832 = vadd.xlane.f32.xlu1 %v781_v46  ;;  %798 = vadd.xlane.f32.xlu0 %v764_v47  ;;  %v632_v37 = vmul.f32 %v1684_v56, %v1742_v16 }
 0x167   : > { %v1182_v0 = vpop.f32.mrb[14].mxu0  ;;  %v1206_v1 = vpop.f32.mrb[14].mxu1  ;;  %v649_v6 = vmul.f32 %v1737_v14, %v1684_v56  ;;  %v648_v10 = vmul.f32 %v1684_v56, %v1746_v17  ;;  %v769_v7 = vmul.f32 %v1735_v13, %v1699_v63  ;;  %v768_v11 = vmul.f32 %v1699_v63, %v1742_v16 }
 0x168   : > { %602 = vst [vmem:[%s1688_s20 + $0x78] sm:$0xff] %v1182_v0  ;;  %v498_v2 = vpop.f32.mrb[15].mxu0  ;;  %618 = vst [vmem:[%s1688_s20 + $0xf8] sm:$0xff] %v1206_v1  ;;  %v578_v3 = vpop.f32.mrb[15].mxu1  ;;  %v1853_v8 = vmul.f32 %v1182_v0, %v1684_v56  ;;  %v1856_v9 = vmul.f32 %v1206_v1, %v1684_v56  ;;  %v1859_v12 = vmul.f32 %v1182_v0, %v1699_v63 }
 0x169   : > { %v1862_v5 = vmul.f32 %v1206_v1, %v1699_v63  ;;  %601 = vst [vmem:[%s1688_s20 + $0x70] sm:$0xff] %v498_v2  ;;  %617 = vst [vmem:[%s1688_s20 + $0xf0] sm:$0xff] %v578_v3  ;;  %v640_v4 = vmul.f32 %v1684_v56, %v498_v2  ;;  %v1868_v15 = vmul.f32 %v1684_v56, %v578_v3  ;;  %s1450_s20 = smov [#allocation7]  }
 0x16a   : > { %v1871_v18 = vmul.f32 %v1699_v63, %v498_v2  ;;  %v1874_v19 = vmul.f32 %v1699_v63, %v578_v3  ;;  %830 = vadd.xlane.f32.xlu0 %v780_v61  ;;  %662 = vadd.xlane.f32.xlu1 %v628_v62  ;;  %v785_v46 = vmul.f32 %v1737_v14, %v1699_v63  ;;  %s1378_s26 = sshll.u32 %s1450_s20, 4  ;;  %s1379_s26 = int_to_ptr.vmem [resolvable:$false] %s1378_s26 }
 0x16b   : > { %v784_v47 = vmul.f32 %v1699_v63, %v1746_v17  ;;  %s1380_s19 = scalar_lea.vmem %s1379_s26, 8192  ;;  %p1381_p13 = scmp.lt.s32.totalorder %s1950_s15, %s1379_s26 }
 0x16c   : > { %p1382_p3 = scmp.lt.s32.totalorder %s1380_s19, %s1374_s25 }
 0x16e   : > { %668 = vadd.xlane.f32.xlu1 %v631_v20  ;;  %666 = vadd.xlane.f32.xlu0 %v630_v21  ;;  %p1383_p7 = por %p1382_p3, %p1381_p13 }
 0x170   : > { %p1384_p9 = pnand %p1383_p7, %p1377_p10 }
 0x172   : > { %700 = vadd.xlane.f32.xlu1 %v647_v22  ;;  %698 = vadd.xlane.f32.xlu0 %v646_v23 }
 0x176   : > { %804 = vadd.xlane.f32.xlu1 %v767_v32  ;;  %802 = vadd.xlane.f32.xlu0 %v766_v33 }
 0x17a   : > { %836 = vadd.xlane.f32.xlu1 %v783_v34  ;;  %834 = vadd.xlane.f32.xlu0 %v782_v35 }
 0x17e   : > { %672 = vadd.xlane.f32.xlu1 %v633_v36  ;;  %670 = vadd.xlane.f32.xlu0 %v632_v37 }
 0x182   : > { %704 = vadd.xlane.f32.xlu1 %v649_v6  ;;  %702 = vadd.xlane.f32.xlu0 %v648_v10 }
 0x186   : > { %808 = vadd.xlane.f32.xlu1 %v769_v7  ;;  %806 = vadd.xlane.f32.xlu0 %v768_v11 }
 0x18a   : > { %840 = vadd.xlane.f32.xlu1 %v785_v46  ;;  %838 = vadd.xlane.f32.xlu0 %v784_v47 }
 0x18e   : > { %676 = vadd.xlane.f32.xlu1 %v1758_v24  ;;  %674 = vadd.xlane.f32.xlu0 %v1772_v28 }
 0x192   : > { %708 = vadd.xlane.f32.xlu1 %v1761_v25  ;;  %706 = vadd.xlane.f32.xlu0 %v1775_v29 }
 0x196   : > { %812 = vadd.xlane.f32.xlu1 %v1764_v26  ;;  %810 = vadd.xlane.f32.xlu0 %v1778_v30 }
 0x19a   : > { %844 = vadd.xlane.f32.xlu1 %v1767_v27  ;;  %842 = vadd.xlane.f32.xlu0 %v1781_v31 }
 0x19e   : > { %680 = vadd.xlane.f32.xlu1 %v1789_v38  ;;  %678 = vadd.xlane.f32.xlu0 %v1803_v42 }
 0x1a2   : > { %712 = vadd.xlane.f32.xlu1 %v1792_v39  ;;  %710 = vadd.xlane.f32.xlu0 %v1806_v43 }
 0x1a6   : > { %816 = vadd.xlane.f32.xlu1 %v1795_v40  ;;  %814 = vadd.xlane.f32.xlu0 %v1809_v44 }
 0x1aa   : > { %848 = vadd.xlane.f32.xlu1 %v1798_v41  ;;  %846 = vadd.xlane.f32.xlu0 %v1812_v45 }
 0x1ae   : > { %684 = vadd.xlane.f32.xlu1 %v1821_v52  ;;  %682 = vadd.xlane.f32.xlu0 %v1835_v57 }
 0x1b2   : > { %716 = vadd.xlane.f32.xlu1 %v1824_v53  ;;  %714 = vadd.xlane.f32.xlu0 %v1838_v58 }
 0x1b6   : > { %820 = vadd.xlane.f32.xlu1 %v1827_v54  ;;  %818 = vadd.xlane.f32.xlu0 %v1841_v59 }
 0x1ba   : > { %852 = vadd.xlane.f32.xlu1 %v1830_v55  ;;  %850 = vadd.xlane.f32.xlu0 %v1844_v60 }
 0x1be   : > { %688 = vadd.xlane.f32.xlu1 %v1853_v8  ;;  %686 = vadd.xlane.f32.xlu0 %v640_v4 }
 0x1c2   : > { %720 = vadd.xlane.f32.xlu1 %v1856_v9  ;;  %718 = vadd.xlane.f32.xlu0 %v1868_v15 }
 0x1c6   : > { %824 = vadd.xlane.f32.xlu1 %v1859_v12  ;;  %822 = vadd.xlane.f32.xlu0 %v1871_v18 }
 0x1ca   : > { %856 = vadd.xlane.f32.xlu1 %v1862_v5  ;;  %854 = vadd.xlane.f32.xlu0 %v1874_v19 }
 0x1cb   : > { %1387 = shalt.err (!%p1384_p9)
}
 0x1cc   : > { %s1388_s8 = scalar_lea.hbm %s1948_s17, 4096  ;;  %s1392_s7 = scalar_lea.hbm %s2140_s4, 8192 }
 0x1cd   : > { %p1389_p1 = scmp.ne.s32.totalorder %s1948_s17, %s1388_s8  ;;  %p1393_p11 = scmp.lt.u32.totalorder %s1948_s17, %s2140_s4 }
 0x1ce   : > { %p1394_p2 = scmp.lt.u32.totalorder %s1392_s7, %s1388_s8  ;;  %p1396_p6 = scmp.lt.u32.totalorder %s1388_s8, %s1948_s17 }
 0x1cf   : > { %p1390_p0 = pnand %p1389_p1, %p1582_p12 }
 0x1d0   : > { %p1395_p4 = por %p1394_p2, %p1393_p11 }
 0x1d1   : > { %p1391_p5 = pneg %p1390_p0 }
 0x1d2   : > { %p1397_p8 = por %p1396_p6, %p1395_p4 }
 0x1d4   : > { %p1398_p10 = pnand %p1397_p8, %p1391_p5 }
 0x1d6   : > { %1401 = shalt.err (!%p1398_p10)
}
 0x1d7   : > { %s1451_s25 = smov 128   ;;  %s1452_s26 = smov 8  }
 0x1d8   : > { %1261 = dma.vmem_to_hbm [thread:$0]  (%p1582_p12), %s1950_s15, 4096, %s1948_s17, %s891_s29, %s1451_s25, %s1451_s25, %s1452_s26  }
 0x1d9   : > { %s1992_s16 = scalar_lea.vmem %s2142_s6, %s1067_s30 }
 0x1db   : > { %v693_v56 = vpop.xlane.xlu1 %692  ;;  %v661_v63 = vpop.xlane.xlu0 %660 }
 0x1dc   : > { %740 = vst.msk [vmem:[%s1957_s27 + $0x88] sm:$0xff] %vm722_vm0, %v693_v56  ;;  %724 = vst.msk [vmem:[%s1957_s27 + $0x8] sm:$0xff] %vm722_vm0, %v661_v63 }
 0x1df   : > { %v797_v13 = vpop.xlane.xlu1 %796  ;;  %v659_v14 = vpop.xlane.xlu0 %658 }
 0x1e0   : > { %859 = vst.msk [vmem:[%s1992_s16 + $0x8] sm:$0xff] %vm722_vm0, %v797_v13  ;;  %723 = vst.msk [vmem:[%s1957_s27] sm:$0xff] %vm722_vm0, %v659_v14 }
 0x1e3   : > { %v829_v16 = vpop.xlane.xlu1 %828  ;;  %v691_v17 = vpop.xlane.xlu0 %690 }
 0x1e4   : > { %875 = vst.msk [vmem:[%s1992_s16 + $0x88] sm:$0xff] %vm722_vm0, %v829_v16  ;;  %739 = vst.msk [vmem:[%s1957_s27 + $0x80] sm:$0xff] %vm722_vm0, %v691_v17 }
 0x1e7   : > { %v795_v24 = vpop.xlane.xlu0 %794  ;;  %v665_v25 = vpop.xlane.xlu1 %664 }
 0x1e8   : > { %858 = vst.msk [vmem:[%s1992_s16] sm:$0xff] %vm722_vm0, %v795_v24  ;;  %726 = vst.msk [vmem:[%s1957_s27 + $0x18] sm:$0xff] %vm722_vm0, %v665_v25 }
 0x1eb   : > { %v827_v26 = vpop.xlane.xlu0 %826  ;;  %v697_v27 = vpop.xlane.xlu1 %696 }
 0x1ec   : > { %874 = vst.msk [vmem:[%s1992_s16 + $0x80] sm:$0xff] %vm722_vm0, %v827_v26  ;;  %742 = vst.msk [vmem:[%s1957_s27 + $0x98] sm:$0xff] %vm722_vm0, %v697_v27 }
 0x1ef   : > { %v695_v28 = vpop.xlane.xlu0 %694  ;;  %v801_v29 = vpop.xlane.xlu1 %800 }
 0x1f0   : > { %741 = vst.msk [vmem:[%s1957_s27 + $0x90] sm:$0xff] %vm722_vm0, %v695_v28  ;;  %861 = vst.msk [vmem:[%s1992_s16 + $0x18] sm:$0xff] %vm722_vm0, %v801_v29 }
 0x1f3   : > { %v833_v30 = vpop.xlane.xlu1 %832  ;;  %v799_v31 = vpop.xlane.xlu0 %798 }
 0x1f4   : > { %877 = vst.msk [vmem:[%s1992_s16 + $0x98] sm:$0xff] %vm722_vm0, %v833_v30  ;;  %860 = vst.msk [vmem:[%s1992_s16 + $0x10] sm:$0xff] %vm722_vm0, %v799_v31 }
 0x1f7   : > { %v831_v38 = vpop.xlane.xlu0 %830  ;;  %v663_v39 = vpop.xlane.xlu1 %662 }
 0x1f8   : > { %876 = vst.msk [vmem:[%s1992_s16 + $0x90] sm:$0xff] %vm722_vm0, %v831_v38  ;;  %725 = vst.msk [vmem:[%s1957_s27 + $0x10] sm:$0xff] %vm722_vm0, %v663_v39 }
 0x1fb   : > { %v669_v40 = vpop.xlane.xlu1 %668  ;;  %v667_v41 = vpop.xlane.xlu0 %666 }
 0x1fc   : > { %728 = vst.msk [vmem:[%s1957_s27 + $0x28] sm:$0xff] %vm722_vm0, %v669_v40  ;;  %727 = vst.msk [vmem:[%s1957_s27 + $0x20] sm:$0xff] %vm722_vm0, %v667_v41 }
 0x1ff   : > { %v701_v42 = vpop.xlane.xlu1 %700  ;;  %v699_v43 = vpop.xlane.xlu0 %698 }
 0x200   : > { %744 = vst.msk [vmem:[%s1957_s27 + $0xa8] sm:$0xff] %vm722_vm0, %v701_v42  ;;  %743 = vst.msk [vmem:[%s1957_s27 + $0xa0] sm:$0xff] %vm722_vm0, %v699_v43 }
 0x203   : > { %v805_v44 = vpop.xlane.xlu1 %804  ;;  %v803_v45 = vpop.xlane.xlu0 %802 }
 0x204   : > { %863 = vst.msk [vmem:[%s1992_s16 + $0x28] sm:$0xff] %vm722_vm0, %v805_v44  ;;  %862 = vst.msk [vmem:[%s1992_s16 + $0x20] sm:$0xff] %vm722_vm0, %v803_v45 }
 0x207   : > { %v837_v48 = vpop.xlane.xlu1 %836  ;;  %v835_v49 = vpop.xlane.xlu0 %834 }
 0x208   : > { %879 = vst.msk [vmem:[%s1992_s16 + $0xa8] sm:$0xff] %vm722_vm0, %v837_v48  ;;  %878 = vst.msk [vmem:[%s1992_s16 + $0xa0] sm:$0xff] %vm722_vm0, %v835_v49 }
 0x20b   : > { %v673_v50 = vpop.xlane.xlu1 %672  ;;  %v671_v51 = vpop.xlane.xlu0 %670 }
 0x20c   : > { %730 = vst.msk [vmem:[%s1957_s27 + $0x38] sm:$0xff] %vm722_vm0, %v673_v50  ;;  %729 = vst.msk [vmem:[%s1957_s27 + $0x30] sm:$0xff] %vm722_vm0, %v671_v51 }
 0x20f   : > { %v705_v52 = vpop.xlane.xlu1 %704  ;;  %v703_v53 = vpop.xlane.xlu0 %702 }
 0x210   : > { %746 = vst.msk [vmem:[%s1957_s27 + $0xb8] sm:$0xff] %vm722_vm0, %v705_v52  ;;  %745 = vst.msk [vmem:[%s1957_s27 + $0xb0] sm:$0xff] %vm722_vm0, %v703_v53 }
 0x213   : > { %v809_v54 = vpop.xlane.xlu1 %808  ;;  %v807_v55 = vpop.xlane.xlu0 %806 }
 0x214   : > { %865 = vst.msk [vmem:[%s1992_s16 + $0x38] sm:$0xff] %vm722_vm0, %v809_v54  ;;  %864 = vst.msk [vmem:[%s1992_s16 + $0x30] sm:$0xff] %vm722_vm0, %v807_v55 }
 0x217   : > { %v841_v57 = vpop.xlane.xlu1 %840  ;;  %v839_v58 = vpop.xlane.xlu0 %838 }
 0x218   : > { %881 = vst.msk [vmem:[%s1992_s16 + $0xb8] sm:$0xff] %vm722_vm0, %v841_v57  ;;  %880 = vst.msk [vmem:[%s1992_s16 + $0xb0] sm:$0xff] %vm722_vm0, %v839_v58 }
 0x21b   : > { %v677_v59 = vpop.xlane.xlu1 %676  ;;  %v675_v60 = vpop.xlane.xlu0 %674 }
 0x21c   : > { %732 = vst.msk [vmem:[%s1957_s27 + $0x48] sm:$0xff] %vm722_vm0, %v677_v59  ;;  %731 = vst.msk [vmem:[%s1957_s27 + $0x40] sm:$0xff] %vm722_vm0, %v675_v60 }
 0x21f   : > { %v709_v61 = vpop.xlane.xlu1 %708  ;;  %v707_v62 = vpop.xlane.xlu0 %706 }
 0x220   : > { %748 = vst.msk [vmem:[%s1957_s27 + $0xc8] sm:$0xff] %vm722_vm0, %v709_v61  ;;  %747 = vst.msk [vmem:[%s1957_s27 + $0xc0] sm:$0xff] %vm722_vm0, %v707_v62 }
 0x223   : > { %v813_v0 = vpop.xlane.xlu1 %812  ;;  %v811_v1 = vpop.xlane.xlu0 %810 }
 0x224   : > { %867 = vst.msk [vmem:[%s1992_s16 + $0x48] sm:$0xff] %vm722_vm0, %v813_v0  ;;  %866 = vst.msk [vmem:[%s1992_s16 + $0x40] sm:$0xff] %vm722_vm0, %v811_v1 }
 0x227   : > { %v845_v2 = vpop.xlane.xlu1 %844  ;;  %v843_v3 = vpop.xlane.xlu0 %842 }
 0x228   : > { %883 = vst.msk [vmem:[%s1992_s16 + $0xc8] sm:$0xff] %vm722_vm0, %v845_v2  ;;  %882 = vst.msk [vmem:[%s1992_s16 + $0xc0] sm:$0xff] %vm722_vm0, %v843_v3 }
 0x22b   : > { %v681_v8 = vpop.xlane.xlu1 %680  ;;  %v679_v9 = vpop.xlane.xlu0 %678 }
 0x22c   : > { %734 = vst.msk [vmem:[%s1957_s27 + $0x58] sm:$0xff] %vm722_vm0, %v681_v8  ;;  %733 = vst.msk [vmem:[%s1957_s27 + $0x50] sm:$0xff] %vm722_vm0, %v679_v9 }
 0x22f   : > { %v713_v12 = vpop.xlane.xlu1 %712  ;;  %v711_v5 = vpop.xlane.xlu0 %710 }
 0x230   : > { %750 = vst.msk [vmem:[%s1957_s27 + $0xd8] sm:$0xff] %vm722_vm0, %v713_v12  ;;  %749 = vst.msk [vmem:[%s1957_s27 + $0xd0] sm:$0xff] %vm722_vm0, %v711_v5 }
 0x233   : > { %v817_v4 = vpop.xlane.xlu1 %816  ;;  %v815_v15 = vpop.xlane.xlu0 %814 }
 0x234   : > { %869 = vst.msk [vmem:[%s1992_s16 + $0x58] sm:$0xff] %vm722_vm0, %v817_v4  ;;  %868 = vst.msk [vmem:[%s1992_s16 + $0x50] sm:$0xff] %vm722_vm0, %v815_v15 }
 0x237   : > { %v849_v18 = vpop.xlane.xlu1 %848  ;;  %v847_v19 = vpop.xlane.xlu0 %846 }
 0x238   : > { %885 = vst.msk [vmem:[%s1992_s16 + $0xd8] sm:$0xff] %vm722_vm0, %v849_v18  ;;  %884 = vst.msk [vmem:[%s1992_s16 + $0xd0] sm:$0xff] %vm722_vm0, %v847_v19 }
 0x23b   : > { %v685_v20 = vpop.xlane.xlu1 %684  ;;  %v683_v21 = vpop.xlane.xlu0 %682 }
 0x23c   : > { %736 = vst.msk [vmem:[%s1957_s27 + $0x68] sm:$0xff] %vm722_vm0, %v685_v20  ;;  %735 = vst.msk [vmem:[%s1957_s27 + $0x60] sm:$0xff] %vm722_vm0, %v683_v21 }
 0x23f   : > { %v717_v22 = vpop.xlane.xlu1 %716  ;;  %v715_v23 = vpop.xlane.xlu0 %714 }
 0x240   : > { %752 = vst.msk [vmem:[%s1957_s27 + $0xe8] sm:$0xff] %vm722_vm0, %v717_v22  ;;  %751 = vst.msk [vmem:[%s1957_s27 + $0xe0] sm:$0xff] %vm722_vm0, %v715_v23 }
 0x243   : > { %v821_v32 = vpop.xlane.xlu1 %820  ;;  %v819_v33 = vpop.xlane.xlu0 %818 }
 0x244   : > { %871 = vst.msk [vmem:[%s1992_s16 + $0x68] sm:$0xff] %vm722_vm0, %v821_v32  ;;  %870 = vst.msk [vmem:[%s1992_s16 + $0x60] sm:$0xff] %vm722_vm0, %v819_v33 }
 0x247   : > { %v853_v34 = vpop.xlane.xlu1 %852  ;;  %v851_v35 = vpop.xlane.xlu0 %850 }
 0x248   : > { %887 = vst.msk [vmem:[%s1992_s16 + $0xe8] sm:$0xff] %vm722_vm0, %v853_v34  ;;  %886 = vst.msk [vmem:[%s1992_s16 + $0xe0] sm:$0xff] %vm722_vm0, %v851_v35 }
 0x24b   : > { %v689_v36 = vpop.xlane.xlu1 %688  ;;  %v687_v37 = vpop.xlane.xlu0 %686 }
 0x24c   : > { %738 = vst.msk [vmem:[%s1957_s27 + $0x78] sm:$0xff] %vm722_vm0, %v689_v36  ;;  %737 = vst.msk [vmem:[%s1957_s27 + $0x70] sm:$0xff] %vm722_vm0, %v687_v37 }
 0x24f   : > { %v721_v6 = vpop.xlane.xlu1 %720  ;;  %v719_v10 = vpop.xlane.xlu0 %718 }
 0x250   : > { %754 = vst.msk [vmem:[%s1957_s27 + $0xf8] sm:$0xff] %vm722_vm0, %v721_v6  ;;  %753 = vst.msk [vmem:[%s1957_s27 + $0xf0] sm:$0xff] %vm722_vm0, %v719_v10 }
 0x253   : > { %v825_v7 = vpop.xlane.xlu1 %824  ;;  %v823_v11 = vpop.xlane.xlu0 %822 }
 0x254   : > { %873 = vst.msk [vmem:[%s1992_s16 + $0x78] sm:$0xff] %vm722_vm0, %v825_v7  ;;  %872 = vst.msk [vmem:[%s1992_s16 + $0x70] sm:$0xff] %vm722_vm0, %v823_v11 }
 0x257   : > { %v857_v46 = vpop.xlane.xlu1 %856  ;;  %v855_v47 = vpop.xlane.xlu0 %854 }
 0x258   : > { %889 = vst.msk [vmem:[%s1992_s16 + $0xf8] sm:$0xff] %vm722_vm0, %v857_v46  ;;  %888 = vst.msk [vmem:[%s1992_s16 + $0xf0] sm:$0xff] %vm722_vm0, %v855_v47 }
 0x259 PF: > { %s937_s14 = sand.u32 1, %s1432_s21   ;;  %p2157_p12 = scmp.ne.s32.totalorder %s2147_s28, 0 }
 0x25a   : > { %p2158_p13 = scmp.ge.s32.totalorder %s1444_s24, 2  ;;  %s938_s12 = scalar_lea.sflag [#allocation4], %s937_s14 }
 0x25c   : > { %p1272_p3 = pnand %p2158_p13, %p2157_p12 }
 0x25e   : > { %1427 = dma.done.wait (!%p1272_p3), %s938_s12, 4096  }
 0x25f   : > { %1429 = vsyncadd (!%p1272_p3), %s938_s12, 4294963200  ;;  %p21_p7 = scmp.ge.s32.totalorder %s1544_s9, 4   ;;  %s2159_s21 = smov %s1436_s22 }
 0x260   : > { %s2160_s22 = smov %s1440_s23  ;;  %s2161_s23 = smov %s1578_s13 }
 0x261   : > { %s2162_s24 = smov %s1544_s9  ;;  %23 = sbr.rel (!%p21_p7) target bundleno = 6 (0x6), region = 109 }
 0x268   :  { %959 = vsyncpa [#allocation3], 1 }
 0x269   :  { %961 = vsyncpa [#allocation3 + $0x1], 1 }
 0x26a   :  { %962 = vsyncpa [#allocation6], 1 }
 0x26b   :  { %963 = vsyncpa [#allocation4], 1 }
 0x26c   :  { %965 = vsyncpa [#allocation4 + $0x1], 1 }

</bundles_post_ra>
